<compile_context>
chip_gen: v5e
topology: v5e:2x2
jax: 0.10.0
libtpu: 0.0.40
codegen_flags: <defaults>
</compile_context>

<pallas_src>
import numpy as np

import jax
import jax.numpy as jnp
from jax.experimental import pallas as pl
from jax.experimental.pallas import tpu as pltpu


def _round_up(x, m):
    return ((x + m - 1) // m) * m


def _pick_batch_tile(B, L, E, k_max, T_pad, C_total, budget_bytes=8 * 1024 * 1024):
    """Largest batch tile whose f32 working set (double-buffered x block +
    im2col scratch + conv activations) stays within ~8 MiB — comfortable under
    v7x's 64 MiB VMEM / 32 MiB default scoped limit."""
    per_sample = 4 * (2 * L * E + T_pad * k_max * E + 2 * T_pad * C_total + 2 * C_total)
    cap = max(1, budget_bytes // max(per_sample, 1))
    if B <= cap:
        return B
    # Output block's sublane dim must be a multiple of 8 (or the full batch),
    # and the tile must divide B exactly.
    cands = [tb for tb in range(8, min(B, cap) + 1, 8) if B % tb == 0]
    return max(cands) if cands else B


def make_fused_kim_cnn_kernel(kernel_sizes, L, E, C, T_pad):
    """One kernel computing relu(conv_k(x)) -> max over time for ALL kernel
    sizes, writing the concatenated (TB, C*len(kernel_sizes)) features."""
    k_max = max(kernel_sizes)
    C_total = C * len(kernel_sizes)

    def kernel(x_ref, w_ref, b_ref, m_ref, o_ref, slab_ref):
        # x_ref:    (TB, L, E)            input embeddings (batch tile)
        # w_ref:    (k_max*E, C_total)    fused, zero-padded conv weights
        # b_ref:    (1, C_total)          fused conv biases
        # m_ref:    (T_pad, C_total)      1.0 where conv position t is valid
        # o_ref:    (TB, C_total)         concatenated max-over-time features
        # slab_ref: (TB, T_pad, k_max*E)  im2col scratch (VMEM)
        TB = x_ref.shape[0]
        x = x_ref[...]                                     # (TB, L, E) f32

        # im2col: slab[b, t, dt*E:(dt+1)*E] = x[b, t+dt, :]  (zeros past L).
        for dt in range(k_max):
            rows = min(T_pad, L - dt)                      # static
            slab_ref[:, :rows, dt * E:(dt + 1) * E] = x[:, dt:dt + rows, :]
            if rows < T_pad:                               # zero the tail rows
                slab_ref[:, rows:, dt * E:(dt + 1) * E] = jnp.zeros(
                    (TB, T_pad - rows, E), jnp.float32)

        # Single MXU matmul for the whole batch tile and all kernel sizes:
        # (TB*T_pad, k_max*E) @ (k_max*E, C_total).
        slab2d = slab_ref[...].reshape(TB * T_pad, k_max * E)
        acc = jnp.dot(slab2d, w_ref[...], preferred_element_type=jnp.float32)
        acc = acc.reshape(TB, T_pad, C_total)

        # Bias + ReLU (VPU), then zero out partial-window / padding rows.
        acc = jnp.maximum(acc + b_ref[...][None, :, :], 0.0)
        acc = acc * m_ref[...][None, :, :]

        # Max-pool over time; one lane-dense store of the concatenated output.
        o_ref[...] = jnp.max(acc, axis=1).astype(o_ref.dtype)

    return kernel


def kim_cnn_forward(x, weights, biases, kernel_sizes):
    """x: (B, L, E) f32.  weights[i]: (k_i, E, C)  (torch Conv2d (C,1,k,E)
    transposed).  biases[i]: (1, C).  Returns (B, C*len(kernel_sizes))."""
    B, L, E = x.shape
    C = weights[0].shape[-1]
    n_sizes = len(kernel_sizes)
    k_max = max(kernel_sizes)
    k_min = min(kernel_sizes)
    assert L >= k_max, "sequence shorter than the largest conv kernel"
    C_total = n_sizes * C
    T_pad = _round_up(L - k_min + 1, 8)    # conv-output rows, sublane-aligned

    # Fuse weights: (k, E, C) -> (k*E, C), zero-pad taps to k_max, concat lanes.
    w_blocks = []
    for k, W in zip(kernel_sizes, weights):
        w2d = W.reshape(k * E, C)
        w2d = jnp.pad(w2d, ((0, (k_max - k) * E), (0, 0)))
        w_blocks.append(w2d)
    w_fused = jnp.concatenate(w_blocks, axis=1)            # (k_max*E, C_total)
    b_fused = jnp.concatenate(list(biases), axis=1)        # (1, C_total)

    # 1.0 where row t is a real "valid" conv output for that kernel-size block.
    mask_np = np.zeros((T_pad, C_total), dtype=np.float32)
    for ki, k in enumerate(kernel_sizes):
        mask_np[: L - k + 1, ki * C:(ki + 1) * C] = 1.0
    valid_mask = jnp.asarray(mask_np)

    TB = _pick_batch_tile(B, L, E, k_max, T_pad, C_total)
    grid = (B // TB,)

    return pl.pallas_call(
        make_fused_kim_cnn_kernel(tuple(kernel_sizes), L, E, C, T_pad),
        out_shape=jax.ShapeDtypeStruct((B, C_total), jnp.float32),
        grid=grid,
        in_specs=[
            pl.BlockSpec((TB, L, E), lambda i: (i, 0, 0)),          # batch tile
            pl.BlockSpec((k_max * E, C_total), lambda i: (0, 0)),   # resident
            pl.BlockSpec((1, C_total), lambda i: (0, 0)),           # resident
            pl.BlockSpec((T_pad, C_total), lambda i: (0, 0)),       # resident
        ],
        out_specs=pl.BlockSpec((TB, C_total), lambda i: (i, 0)),
        scratch_shapes=[pltpu.VMEM((TB, T_pad, k_max * E), jnp.float32)],
        compiler_params=pltpu.CompilerParams(
            dimension_semantics=("parallel",)),
    )(x, w_fused, b_fused, valid_mask)


def ref_forward(x, weights, biases, kernel_sizes):
    """Pure-JAX reference replicating the PyTorch Kim_CNN forward."""
    B, L, E = x.shape
    outs = []
    for k, W, b in zip(kernel_sizes, weights, biases):
        T = L - k + 1
        patches = jnp.stack([x[:, dt:dt + T, :] for dt in range(k)], axis=2)  # (B,T,k,E)
        conv = jnp.einsum('btke,kec->btc', patches, W,
                          preferred_element_type=jnp.float32) + b[0][None, None, :]
        conv = jnp.maximum(conv, 0.0)
        outs.append(jnp.max(conv, axis=1))
    return jnp.concatenate(outs, axis=1)


if __name__ == "__main__":
    # Synthetic config (small shapes): config['embed_dim']=16 (!=300 => model
    # embed_dim=32), kernel_num=8, kernel_sizes="3,4,5".  n_classes / fc_dim
    # are unused by Kim_CNN.forward().
    config_embed_dim = 16
    embed_dim = config_embed_dim if config_embed_dim == 300 else 2 * config_embed_dim  # 32
    num_kernels = 8
    kernel_sizes = [3, 4, 5]

    B, L, E, C = 2, 16, embed_dim, num_kernels

    key = jax.random.PRNGKey(0)
    kx, *kws = jax.random.split(key, 1 + 2 * len(kernel_sizes))

    x = jax.random.normal(kx, (B, L, E), dtype=jnp.float32)

    weights, biases = [], []
    for i, k in enumerate(kernel_sizes):
        kw, kb = kws[2 * i], kws[2 * i + 1]
        # torch Conv2d weight is (C, 1, k, E); store transposed as (k, E, C).
        fan_in = 1 * k * E
        bound = 1.0 / (fan_in ** 0.5)
        W = jax.random.uniform(kw, (k, E, C), jnp.float32, -bound, bound)
        b = jax.random.uniform(kb, (1, C), jnp.float32, -bound, bound)
        weights.append(W)
        biases.append(b)

    out = jax.block_until_ready(kim_cnn_forward(x, weights, biases, kernel_sizes))
    ref = jax.block_until_ready(ref_forward(x, weights, biases, kernel_sizes))

    assert out.shape == (B, C * len(kernel_sizes)), out.shape
    assert jnp.allclose(out, ref, atol=1e-4, rtol=1e-4), "mismatch vs pure-JAX reference"

    print("KERNEL_OK")
</pallas_src>

<mosaic_0001>
module attributes {stable_mosaic.version = 11 : i64} {
  func.func @kernel(%arg0: i32, %arg1: memref<2x16x32xf32, #tpu.memory_space<vmem>>, %arg2: memref<160x24xf32, #tpu.memory_space<vmem>>, %arg3: memref<1x24xf32, #tpu.memory_space<vmem>>, %arg4: memref<16x24xf32, #tpu.memory_space<vmem>>, %arg5: memref<2x24xf32, #tpu.memory_space<vmem>>, %arg6: memref<2x16x160xf32, #tpu.memory_space<vmem>>) attributes {dimension_semantics = [#tpu.dimension_semantics<parallel>], iteration_bounds = array<i64: 1>, scalar_prefetch = 0 : i64, scratch_operands = 1 : i64, tpu.core_type = #tpu.core_type<tc>, window_params = [{transform_indices = @transform_0, window_bounds = array<i64: 2, 16, 32>}, {pipeline_mode = #tpu.pipeline_mode<synchronous>, transform_indices = @transform_1, window_bounds = array<i64: 160, 24>}, {pipeline_mode = #tpu.pipeline_mode<synchronous>, transform_indices = @transform_2, window_bounds = array<i64: 1, 24>}, {pipeline_mode = #tpu.pipeline_mode<synchronous>, transform_indices = @transform_3, window_bounds = array<i64: 16, 24>}, {transform_indices = @transform_4, window_bounds = array<i64: 2, 24>}]} {
    %c0 = arith.constant 0 : index
    %c0_0 = arith.constant 0 : index
    %c0_1 = arith.constant 0 : index
    %0 = vector.load %arg1[%c0, %c0_0, %c0_1] : memref<2x16x32xf32, #tpu.memory_space<vmem>>, vector<2x16x32xf32>
    %c0_2 = arith.constant 0 : index
    %c0_3 = arith.constant 0 : index
    %c0_4 = arith.constant 0 : index
    %1 = vector.load %arg6[%c0_2, %c0_3, %c0_4] : memref<2x16x160xf32, #tpu.memory_space<vmem>>, vector<2x16x32xf32>
    tpu.vector_store %arg6[%c0_2, %c0_3, %c0_4], %0 {strides = array<i32>} : memref<2x16x160xf32, #tpu.memory_space<vmem>>, vector<2x16x32xf32>,
    %2 = vector.extract_strided_slice %0 {offsets = [0, 1, 0], sizes = [2, 15, 32], strides = [1, 1, 1]} : vector<2x16x32xf32> to vector<2x15x32xf32>
    %c0_5 = arith.constant 0 : index
    %c0_6 = arith.constant 0 : index
    %c32 = arith.constant 32 : index
    %3 = vector.load %arg6[%c0_5, %c0_6, %c32] : memref<2x16x160xf32, #tpu.memory_space<vmem>>, vector<2x15x32xf32>
    tpu.vector_store %arg6[%c0_5, %c0_6, %c32], %2 {strides = array<i32>} : memref<2x16x160xf32, #tpu.memory_space<vmem>>, vector<2x15x32xf32>,
    %cst = arith.constant 0.000000e+00 : f32
    %4 = vector.broadcast %cst : f32 to vector<2x1x32xf32>
    %c0_7 = arith.constant 0 : index
    %c15 = arith.constant 15 : index
    %c32_8 = arith.constant 32 : index
    %5 = vector.load %arg6[%c0_7, %c15, %c32_8] : memref<2x16x160xf32, #tpu.memory_space<vmem>>, vector<2x1x32xf32>
    tpu.vector_store %arg6[%c0_7, %c15, %c32_8], %4 {strides = array<i32>} : memref<2x16x160xf32, #tpu.memory_space<vmem>>, vector<2x1x32xf32>,
    %6 = vector.extract_strided_slice %0 {offsets = [0, 2, 0], sizes = [2, 14, 32], strides = [1, 1, 1]} : vector<2x16x32xf32> to vector<2x14x32xf32>
    %c0_9 = arith.constant 0 : index
    %c0_10 = arith.constant 0 : index
    %c64 = arith.constant 64 : index
    %7 = vector.load %arg6[%c0_9, %c0_10, %c64] : memref<2x16x160xf32, #tpu.memory_space<vmem>>, vector<2x14x32xf32>
    tpu.vector_store %arg6[%c0_9, %c0_10, %c64], %6 {strides = array<i32>} : memref<2x16x160xf32, #tpu.memory_space<vmem>>, vector<2x14x32xf32>,
    %cst_11 = arith.constant 0.000000e+00 : f32
    %8 = vector.broadcast %cst_11 : f32 to vector<2x2x32xf32>
    %c0_12 = arith.constant 0 : index
    %c14 = arith.constant 14 : index
    %c64_13 = arith.constant 64 : index
    %9 = vector.load %arg6[%c0_12, %c14, %c64_13] : memref<2x16x160xf32, #tpu.memory_space<vmem>>, vector<2x2x32xf32>
    tpu.vector_store %arg6[%c0_12, %c14, %c64_13], %8 {strides = array<i32>} : memref<2x16x160xf32, #tpu.memory_space<vmem>>, vector<2x2x32xf32>,
    %10 = vector.extract_strided_slice %0 {offsets = [0, 3, 0], sizes = [2, 13, 32], strides = [1, 1, 1]} : vector<2x16x32xf32> to vector<2x13x32xf32>
    %c0_14 = arith.constant 0 : index
    %c0_15 = arith.constant 0 : index
    %c96 = arith.constant 96 : index
    %11 = vector.load %arg6[%c0_14, %c0_15, %c96] : memref<2x16x160xf32, #tpu.memory_space<vmem>>, vector<2x13x32xf32>
    tpu.vector_store %arg6[%c0_14, %c0_15, %c96], %10 {strides = array<i32>} : memref<2x16x160xf32, #tpu.memory_space<vmem>>, vector<2x13x32xf32>,
    %cst_16 = arith.constant 0.000000e+00 : f32
    %12 = vector.broadcast %cst_16 : f32 to vector<2x3x32xf32>
    %c0_17 = arith.constant 0 : index
    %c13 = arith.constant 13 : index
    %c96_18 = arith.constant 96 : index
    %13 = vector.load %arg6[%c0_17, %c13, %c96_18] : memref<2x16x160xf32, #tpu.memory_space<vmem>>, vector<2x3x32xf32>
    tpu.vector_store %arg6[%c0_17, %c13, %c96_18], %12 {strides = array<i32>} : memref<2x16x160xf32, #tpu.memory_space<vmem>>, vector<2x3x32xf32>,
    %14 = vector.extract_strided_slice %0 {offsets = [0, 4, 0], sizes = [2, 12, 32], strides = [1, 1, 1]} : vector<2x16x32xf32> to vector<2x12x32xf32>
    %c0_19 = arith.constant 0 : index
    %c0_20 = arith.constant 0 : index
    %c128 = arith.constant 128 : index
    %15 = vector.load %arg6[%c0_19, %c0_20, %c128] : memref<2x16x160xf32, #tpu.memory_space<vmem>>, vector<2x12x32xf32>
    tpu.vector_store %arg6[%c0_19, %c0_20, %c128], %14 {strides = array<i32>} : memref<2x16x160xf32, #tpu.memory_space<vmem>>, vector<2x12x32xf32>,
    %cst_21 = arith.constant 0.000000e+00 : f32
    %16 = vector.broadcast %cst_21 : f32 to vector<2x4x32xf32>
    %c0_22 = arith.constant 0 : index
    %c12 = arith.constant 12 : index
    %c128_23 = arith.constant 128 : index
    %17 = vector.load %arg6[%c0_22, %c12, %c128_23] : memref<2x16x160xf32, #tpu.memory_space<vmem>>, vector<2x4x32xf32>
    tpu.vector_store %arg6[%c0_22, %c12, %c128_23], %16 {strides = array<i32>} : memref<2x16x160xf32, #tpu.memory_space<vmem>>, vector<2x4x32xf32>,
    %c0_24 = arith.constant 0 : index
    %c0_25 = arith.constant 0 : index
    %c0_26 = arith.constant 0 : index
    %18 = vector.load %arg6[%c0_24, %c0_25, %c0_26] : memref<2x16x160xf32, #tpu.memory_space<vmem>>, vector<2x16x160xf32>
    %19 = vector.shape_cast %18 : vector<2x16x160xf32> to vector<32x160xf32>
    %c0_27 = arith.constant 0 : index
    %c0_28 = arith.constant 0 : index
    %20 = vector.load %arg2[%c0_27, %c0_28] : memref<160x24xf32, #tpu.memory_space<vmem>>, vector<160x24xf32>
    %cst_29 = arith.constant dense<0.000000e+00> : vector<32x24xf32>
    %21 = tpu.matmul %19, %20, %cst_29 {dimension_numbers = #tpu.dot_dimension_numbers<[1], [0], [0], [1], [0, 0, 1, 1], [], []>} : vector<32x160xf32>, vector<160x24xf32>, vector<32x24xf32> -> vector<32x24xf32>
    %22 = vector.shape_cast %21 : vector<32x24xf32> to vector<2x16x24xf32>
    %c0_30 = arith.constant 0 : index
    %c0_31 = arith.constant 0 : index
    %23 = vector.load %arg3[%c0_30, %c0_31] : memref<1x24xf32, #tpu.memory_space<vmem>>, vector<1x24xf32>
    %24 = vector.shape_cast %23 : vector<1x24xf32> to vector<1x1x24xf32>
    %25 = vector.broadcast %24 : vector<1x1x24xf32> to vector<2x16x24xf32>
    %26 = arith.addf %22, %25 : vector<2x16x24xf32>
    %cst_32 = arith.constant 0.000000e+00 : f32
    %27 = vector.broadcast %cst_32 : f32 to vector<2x16x24xf32>
    %28 = arith.maximumf %26, %27 : vector<2x16x24xf32>
    %c0_33 = arith.constant 0 : index
    %c0_34 = arith.constant 0 : index
    %29 = vector.load %arg4[%c0_33, %c0_34] : memref<16x24xf32, #tpu.memory_space<vmem>>, vector<16x24xf32>
    %30 = vector.shape_cast %29 : vector<16x24xf32> to vector<1x16x24xf32>
    %31 = vector.broadcast %30 : vector<1x16x24xf32> to vector<2x16x24xf32>
    %32 = arith.mulf %28, %31 : vector<2x16x24xf32>
    %cst_35 = arith.constant dense<0xFF800000> : vector<2x24xf32>
    %33 = vector.multi_reduction <maximumf>, %32, %cst_35 [1] : vector<2x16x24xf32> to vector<2x24xf32>
    %c0_36 = arith.constant 0 : index
    %c0_37 = arith.constant 0 : index
    %34 = vector.load %arg5[%c0_36, %c0_37] : memref<2x24xf32, #tpu.memory_space<vmem>>, vector<2x24xf32>
    tpu.vector_store %arg5[%c0_36, %c0_37], %33 {strides = array<i32>} : memref<2x24xf32, #tpu.memory_space<vmem>>, vector<2x24xf32>,
    return
  }
  func.func @transform_0(%arg0: i32) -> (i32, i32, i32) {
    %c0_i32 = arith.constant 0 : i32
    %c0_i32_0 = arith.constant 0 : i32
    %c0_i32_1 = arith.constant 0 : i32
    return %arg0, %c0_i32, %c0_i32_0 : i32, i32, i32
  }
  func.func @transform_1(%arg0: i32) -> (i32, i32) {
    %c0_i32 = arith.constant 0 : i32
    %c0_i32_0 = arith.constant 0 : i32
    %c0_i32_1 = arith.constant 0 : i32
    return %c0_i32, %c0_i32_0 : i32, i32
  }
  func.func @transform_2(%arg0: i32) -> (i32, i32) {
    %c0_i32 = arith.constant 0 : i32
    %c0_i32_0 = arith.constant 0 : i32
    %c0_i32_1 = arith.constant 0 : i32
    return %c0_i32, %c0_i32_0 : i32, i32
  }
  func.func @transform_3(%arg0: i32) -> (i32, i32) {
    %c0_i32 = arith.constant 0 : i32
    %c0_i32_0 = arith.constant 0 : i32
    %c0_i32_1 = arith.constant 0 : i32
    return %c0_i32, %c0_i32_0 : i32, i32
  }
  func.func @transform_4(%arg0: i32) -> (i32, i32) {
    %c0_i32 = arith.constant 0 : i32
    %c0_i32_0 = arith.constant 0 : i32
    return %arg0, %c0_i32 : i32, i32
  }
}

</mosaic_0001>

<bundles_post_ra>
// kernel: tpu_custom_call.1
= control target key start
LH: loop header
LB: loop body
LE: loop exit
PB: predicated region body
PF: predicated region fallthrough
CT: control target
= control target key end

     0   :  { %vm22_vm0 = vcmask 261120   ;;  %vm87_vm1 = vcmask 1044480   ;;  %vm115_vm2 = vcmask 1043456   ;;  %vm127_vm3 = vcmask 257024   ;;  %s360_s23 = smov 96   ;;  %s361_s24 = smov 32   ;;  %s545_s0 = inlined_call_operand.vmem [shape: f32[2,16,32], index: 0, kind: input, shape index: {}]   ;;  %s546_s1 = inlined_call_operand.vmem [shape: f32[160,24], index: 1, kind: input, shape index: {}]   ;;  %s547_s2 = inlined_call_operand.vmem [shape: f32[1,24], index: 2, kind: input, shape index: {}]   ;;  %s548_s3 = inlined_call_operand.vmem [shape: f32[16,24], index: 3, kind: input, shape index: {}]   ;;  %s549_s4 = inlined_call_operand.hbm [shape: f32[2,24], index: 4, kind: output, shape index: {}]  }
   0x1   :  { %v20_v0 = vld [vmem:[%s545_s0 + $0x10] sm:$0xff]  ;;  %v396_v1 = vld [vmem:[%s545_s0 + $0x18] sm:$0xff]  ;;  %vm31_vm4 = vcmask 1046528   ;;  %v412_v10 = vld [vmem:[%s545_s0 + $0x8] sm:$0xff]  ;;  %vm59_vm5 = vcmask 1045504  }
   0x2   :  { %v91_v2 = vrot.slane %v20_v0, 3  ;;  %v92_v3 = vrot.slane %v396_v1, 3  ;;  %v119_v4 = vrot.slane %v20_v0, 4  ;;  %v120_v5 = vrot.slane %v396_v1, 4  ;;  %25 = vst.msk [vmem:[#allocation2 + $0x20] sm:$0xff] %vm22_vm0, %v20_v0  ;;  %v417_v11 = vld [vmem:[%s545_s0] sm:$0xff] }
   0x3   :  { %26 = vst.msk [vmem:[#allocation2 + $0x30] sm:$0xff] %vm22_vm0, %v396_v1  ;;  %v35_v6 = vrot.slane %v20_v0, 1  ;;  %v36_v7 = vrot.slane %v396_v1, 1  ;;  %v117_v13 = vrot.slane %v412_v10, 4  ;;  %v157_v14 = vld [vmem:[%s546_s1 + $0x78] sm:$0xff]  ;;  %v156_v15 = vld [vmem:[%s546_s1 + $0x70] sm:$0xff] }
   0x4   :  { %v93_v8 = vsel %vm87_vm1, %v91_v2, %v92_v3  ;;  %v121_v9 = vsel %vm115_vm2, %v119_v4, %v120_v5  ;;  %130 = vst.msk [vmem:[#allocation2 + $0x38] sm:$0xf] %vm127_vm3, %v120_v5  ;;  %v116_v16 = vrot.slane %v417_v11, 4  ;;  %297 = vmatpush.msra.mxu3 %v157_v14  ;;  %v63_v17 = vrot.slane %v20_v0, 2  ;;  %v155_v19 = vld [vmem:[%s546_s1 + $0x68] sm:$0xff]  ;;  %296 = vmatpush.msra.mxu2 %v157_v14  ;;  %v154_v22 = vld [vmem:[%s546_s1 + $0x60] sm:$0xff] }
   0x5   :  { %129 = vst.msk [vmem:[#allocation2 + $0x28] sm:$0xff] %vm22_vm0, %v121_v9  ;;  %98 = vrot.lane.b32.xlu1 %v93_v8, %s360_s23  ;;  %v37_v12 = vsel %vm31_vm4, %v35_v6, %v36_v7  ;;  %44 = vrot.lane.b32.xlu2 %v36_v7, %s361_s24  ;;  %v64_v18 = vrot.slane %v396_v1, 2  ;;  %v33_v21 = vrot.slane %v412_v10, 1 }
   0x6   :  { %42 = vrot.lane.b32.xlu0 %v37_v12, %s361_s24  ;;  %24 = vst.msk [vmem:[#allocation2 + $0x10] sm:$0xff] %vm22_vm0, %v412_v10  ;;  %174 = vmatpush.msra.mxu0 %v157_v14  ;;  %v118_v20 = vsel %vm115_vm2, %v116_v16, %v117_v13 }
   0x7   :  { %128 = vst.msk [vmem:[#allocation2 + $0x18] sm:$0xf] %vm127_vm3, %v117_v13  ;;  %299 = vmatpush.msra.mxu3 %v156_v15  ;;  %298 = vmatpush.msra.mxu2 %v156_v15 }
   0x8   :  { %23 = vst.msk [vmem:[#allocation2] sm:$0xff] %vm22_vm0, %v417_v11  ;;  %175 = vmatpush.msra.mxu0 %v156_v15 }
   0x9   :  { %126 = vst.msk [vmem:[#allocation2 + $0x8] sm:$0xff] %vm22_vm0, %v118_v20 }
   0xa   :  { %9 = vsyncpa [#allocation4], 0  ;;  %301 = vmatpush.msra.mxu3 %v155_v19  ;;  %v65_v23 = vsel %vm59_vm5, %v63_v17, %v64_v18  ;;  %v61_v24 = vrot.slane %v412_v10, 2  ;;  %v153_v25 = vld [vmem:[%s546_s1 + $0x58] sm:$0xff]  ;;  %300 = vmatpush.msra.mxu2 %v155_v19  ;;  %s362_s8 = smov 64   ;;  %v152_v26 = vld [vmem:[%s546_s1 + $0x50] sm:$0xff] }
   0xb   :  { %176 = vmatpush.msra.mxu0 %v155_v19  ;;  %v151_v27 = vld [vmem:[%s546_s1 + $0x48] sm:$0xff]  ;;  %v89_v28 = vrot.slane %v412_v10, 3  ;;  %v60_v29 = vrot.slane %v417_v11, 2  ;;  %v88_v30 = vrot.slane %v417_v11, 3  ;;  %v32_v31 = vrot.slane %v417_v11, 1  ;;  %v150_v35 = vld [vmem:[%s546_s1 + $0x40] sm:$0xff] }
   0xc   :  { %303 = vmatpush.msra.mxu3 %v154_v22  ;;  %302 = vmatpush.msra.mxu2 %v154_v22  ;;  %v161_v36 = vld [vmem:[%s546_s1 + $0x98] sm:$0xff]  ;;  %vm56_vm6 = vcmask 516352   ;;  %v160_v38 = vld [vmem:[%s546_s1 + $0x90] sm:$0xff]  ;;  %v363_v39 = vmov 0.0   ;;  %v159_v41 = vld [vmem:[%s546_s1 + $0x88] sm:$0xff]  ;;  %vm52_vm7 = vcmask 522496  }
   0xd   :  { %40 = vrot.lane.b32.xlu1 %v33_v21, %s361_s24  ;;  %68 = vrot.lane.b32.xlu2 %v61_v24, %s362_s8  ;;  %v62_v32 = vsel %vm59_vm5, %v60_v29, %v61_v24  ;;  %v90_v33 = vsel %vm87_vm1, %v88_v30, %v89_v28  ;;  %v34_v34 = vsel %vm31_vm4, %v32_v31, %v33_v21  ;;  %v149_v37 = vld [vmem:[%s546_s1 + $0x38] sm:$0xff]  ;;  %v148_v40 = vld [vmem:[%s546_s1 + $0x30] sm:$0xff]  ;;  %vm84_vm8 = vcmask 785926   ;;  %v139_v52 = vld [vmem:[#allocation2 + $0x28] sm:$0xff]  ;;  %s283_s19 = sshll.u32 %s549_s4, 4  ;;  %s284_s19 = int_to_ptr.hbm [resolvable:$true] %s283_s19 }
   0xe   :  { %70 = vrot.lane.b32.xlu0 %v65_v23, %s362_s8  ;;  %305 = vmatpush.msra.mxu3 %v153_v25  ;;  %58 = vst.msk [vmem:[#allocation2 + $0x37] sm:$0x1] %vm56_vm6, %v363_v39  ;;  %v147_v42 = vld [vmem:[%s546_s1 + $0x28] sm:$0xff]  ;;  %v158_v43 = vld [vmem:[%s546_s1 + $0x80] sm:$0xff]  ;;  %vm131_vm9 = vcmask 261124   ;;  %v145_v47 = vld [vmem:[%s546_s1 + $0x18] sm:$0xff] }
   0xf   :  { %177 = vmatpush.msra.mxu0 %v154_v22  ;;  %304 = vmatpush.msra.mxu2 %v153_v25  ;;  %57 = vst.msk [vmem:[#allocation2 + $0x17] sm:$0x1] %vm56_vm6, %v363_v39  ;;  %v146_v46 = vld [vmem:[%s546_s1 + $0x20] sm:$0xff]  ;;  %v144_v48 = vld [vmem:[%s546_s1 + $0x10] sm:$0xff]  ;;  %v143_v49 = vld [vmem:[%s546_s1 + $0x8] sm:$0xff]  ;;  %vm50_vm10 = vcmask 523520  }
  0x10   :  { %307 = vmatpush.msra.mxu3 %v152_v26  ;;  %215 = vmatpush.msra.mxu1 %v161_v36  ;;  %v135_v45 = vld [vmem:[#allocation2 + $0x8] sm:$0xff]  ;;  %132 = vst.msk [vmem:[#allocation2 + $0x18] sm:$0xf0] %vm131_vm9, %v363_v39  ;;  %v142_v51 = vld [vmem:[%s546_s1] sm:$0xff]  ;;  %vm78_vm11 = vcmask 785920   ;;  %vm106_vm12 = vcmask 1048320  }
  0x11   :  { %178 = vmatpush.msra.mxu0 %v153_v25  ;;  %306 = vmatpush.msra.mxu2 %v152_v26  ;;  %133 = vst.msk [vmem:[#allocation2 + $0x38] sm:$0xf0] %vm131_vm9, %v363_v39  ;;  %vm80_vm13 = vcmask 783872   ;;  %vm112_vm14 = vcmask 1048325   ;;  %vm108_vm15 = vcmask 1045248   ;;  %v244_v19 = vld [vmem:[%s548_s3] sm:$0xff] }
  0x12   :  { %309 = vmatpush.msra.mxu3 %v151_v27  ;;  %216 = vmatpush.msra.mxu1 %v160_v38  ;;  %v333_v10 = vld [vmem:[%s547_s2] ss:$0 sm:$0xff]  ;;  %v245_v24 = vld [vmem:[%s548_s3 + $0x8] sm:$0xff]  ;;  %s364_s2 = smov [#allocation3]   ;;  %vm271_vm1 = vcmask 1041409   ;;  %vm274_vm2 = vcmask 189440  }
  0x13   :  { %179 = vmatpush.msra.mxu0 %v152_v26  ;;  %308 = vmatpush.msra.mxu2 %v151_v27  ;;  %s281_s3 = sshll.u32 %s364_s2, 4  ;;  %s282_s3 = int_to_ptr.vmem [resolvable:$true] %s281_s3 }
  0x14   :  { %311 = vmatpush.msra.mxu3 %v150_v35  ;;  %217 = vmatpush.msra.mxu1 %v159_v41 }
  0x15   :  { %96 = vrot.lane.b32.xlu1 %v89_v28, %s360_s23  ;;  %100 = vrot.lane.b32.xlu2 %v92_v3, %s360_s23 }
  0x16   :  { %72 = vrot.lane.b32.xlu0 %v64_v18, %s362_s8  ;;  %180 = vmatpush.msra.mxu0 %v151_v27 }
  0x17   :  { %310 = vmatpush.msra.mxu2 %v150_v35  ;;  %313 = vmatpush.msra.mxu3 %v149_v37  ;;  %v137_v50 = vld [vmem:[#allocation2 + $0x18] sm:$0xff] }
  0x18   :  { %181 = vmatpush.msra.mxu0 %v150_v35  ;;  %218 = vmatpush.msra.mxu1 %v158_v43  ;;  %v141_v54 = vld [vmem:[#allocation2 + $0x38] sm:$0xff] }
  0x19   :  { %312 = vmatpush.msra.mxu2 %v149_v37  ;;  %315 = vmatpush.msra.mxu3 %v148_v40 }
  0x1a   :  { %182 = vmatpush.msra.mxu0 %v149_v37  ;;  %292 = vmatmul.msk.f32.vlgmr.msra.gmra.mxu1 %vm22_vm0, %v135_v45 }
  0x1b   :  { %314 = vmatpush.msra.mxu2 %v148_v40  ;;  %317 = vmatpush.msra.mxu3 %v147_v42 }
  0x1c   :  { %183 = vmatpush.msra.mxu0 %v148_v40 }
  0x1d   :  { %66 = vrot.lane.b32.xlu1 %v62_v32, %s362_s8  ;;  %94 = vrot.lane.b32.xlu2 %v90_v33, %s360_s23 }
  0x1e   :  { %38 = vrot.lane.b32.xlu0 %v34_v34, %s361_s24  ;;  %316 = vmatpush.msra.mxu2 %v147_v42 }
  0x1f   :  { %319 = vmatpush.msra.mxu3 %v146_v46  ;;  %184 = vmatpush.msra.mxu0 %v147_v42 }
  0x20   :  { %318 = vmatpush.msra.mxu2 %v146_v46 }
  0x21   :  { %185 = vmatpush.msra.mxu0 %v146_v46  ;;  %321 = vmatpush.msra.mxu3 %v145_v47 }
  0x22   :  { %320 = vmatpush.msra.mxu2 %v145_v47  ;;  %293 = vmatmul.msk.f32.gmra.mxu1 %vm22_vm0, %v137_v50 }
  0x23   :  { %186 = vmatpush.msra.mxu0 %v145_v47  ;;  %323 = vmatpush.msra.mxu3 %v144_v48 }
  0x24   :  { %322 = vmatpush.msra.mxu2 %v144_v48 }
  0x25   :  { %187 = vmatpush.msra.mxu0 %v144_v48  ;;  %325 = vmatpush.msra.mxu3 %v143_v49 }
  0x26   :  { %324 = vmatpush.msra.mxu2 %v143_v49 }
  0x27   :  { %188 = vmatpush.msra.mxu0 %v143_v49  ;;  %327 = vmatpush.msra.mxu3 %v142_v51 }
  0x28   :  { %326 = vmatpush.msra.mxu2 %v142_v51 }
  0x29   :  { %189 = vmatpush.msra.mxu0 %v142_v51 }
  0x2a   :  { %294 = vmatmul.msk.f32.gmra.mxu1 %vm22_vm0, %v139_v52 }
  0x32   :  { %295 = vmatmul.msk.f32.gmra.mxu1 %vm22_vm0, %v141_v54  ;;  %vm250_vm0 = vcmask 195584  }
  0x5f   :  { %v45_v44 = vpop.permute.xlu2 %44 }
  0x60   :  { %55 = vst.msk [vmem:[#allocation2 + $0x30] sm:$0x7f] %vm52_vm7, %v45_v44 }
  0x61   :  { %86 = vst.msk [vmem:[#allocation2 + $0x30] sm:$0xc0] %vm84_vm8, %v363_v39 }
  0x67   :  { %v69_v56 = vpop.permute.xlu2 %68 }
  0x6f   :  { %v101_v59 = vpop.permute.xlu2 %100 }
  0x77   :  { %v99_v53 = vpop.permute.xlu1 %98  ;;  %v95_v2 = vpop.permute.xlu2 %94 }
  0x78   :  { %v43_v55 = vpop.permute.xlu0 %42 }
  0x79   :  { %54 = vst.msk [vmem:[#allocation2 + $0x20] sm:$0xff] %vm50_vm10, %v43_v55 }
  0x7f   :  { %v41_v57 = vpop.permute.xlu1 %40 }
  0x80   :  { %v71_v58 = vpop.permute.xlu0 %70  ;;  %53 = vst.msk [vmem:[#allocation2 + $0x10] sm:$0x7f] %vm52_vm7, %v41_v57 }
  0x81   :  { %82 = vst.msk [vmem:[#allocation2 + $0x20] sm:$0xff] %vm78_vm11, %v71_v58 }
  0x82   :  { %110 = vst.msk [vmem:[#allocation2 + $0x20] sm:$0xff] %vm106_vm12, %v99_v53 }
  0x83   :  { %85 = vst.msk [vmem:[#allocation2 + $0x10] sm:$0xc0] %vm84_vm8, %v363_v39 }
  0x84   :  { %81 = vst.msk [vmem:[#allocation2 + $0x10] sm:$0x3f] %vm80_vm13, %v69_v56 }
  0x85   :  { %113 = vst.msk [vmem:[#allocation2 + $0x10] sm:$0xe0] %vm112_vm14, %v363_v39 }
  0x87   :  { %v97_v60 = vpop.permute.xlu1 %96 }
  0x88   :  { %v73_v61 = vpop.permute.xlu0 %72  ;;  %109 = vst.msk [vmem:[#allocation2 + $0x10] sm:$0x1f] %vm108_vm15, %v97_v60 }
  0x89   :  { %83 = vst.msk [vmem:[#allocation2 + $0x30] sm:$0x3f] %vm80_vm13, %v73_v61  ;;  %v138_v62 = vld [vmem:[#allocation2 + $0x20] sm:$0xff] }
  0x8a   :  { %114 = vst.msk [vmem:[#allocation2 + $0x30] sm:$0xe0] %vm112_vm14, %v363_v39  ;;  %196 = vmatmul.f32.vlgmr.msra.gmra.mxu3 %v138_v62 }
  0x8b   :  { %111 = vst.msk [vmem:[#allocation2 + $0x30] sm:$0x1f] %vm108_vm15, %v101_v59 }
  0x8f   :  { %v136_v63 = vld [vmem:[#allocation2 + $0x10] sm:$0xff]  ;;  %v67_v0 = vpop.permute.xlu1 %66 }
  0x90   :  { %v39_v1 = vpop.permute.xlu0 %38  ;;  %193 = vmatmul.f32.vlgmr.msra.gmra.mxu2 %v136_v63 }
  0x91   :  { %51 = vst.msk [vmem:[#allocation2] sm:$0xff] %vm50_vm10, %v39_v1 }
  0x92   :  { %79 = vst.msk [vmem:[#allocation2] sm:$0xff] %vm78_vm11, %v67_v0  ;;  %v140_v3 = vld [vmem:[#allocation2 + $0x30] sm:$0xff] }
  0x93   :  { %199 = vmatmul.f32.gmra.mxu3 %v140_v3  ;;  %107 = vst.msk [vmem:[#allocation2] sm:$0xff] %vm106_vm12, %v95_v2 }
  0x97   :  { %v220_v5 = vpop.f32.mrf.mxu1 }
  0x9a   :  { %v134_v4 = vld [vmem:[#allocation2] sm:$0xff] }
  0x9b   :  { %190 = vmatmul.f32.vlgmr.msra.gmra.mxu0 %v134_v4 }
  0x9f   :  { %v223_v6 = vpop.f32.mrf.mxu1 }
  0xa7   :  { %v226_v7 = vpop.f32.mrf.mxu1 }
  0xaf   :  { %v229_v14 = vpop.f32.mrf.mxu1 }
 0x10d   :  { %v197_v8 = vpop.f32.mrf.mxu3 }
 0x10e   :  { %v227_v9 = vadd.f32 %v226_v7, %v197_v8 }
 0x110   :  { %v238_v11 = vadd.f32 %v333_v10, %v227_v9 }
 0x112   :  { %v242_v17 = vmax.f32 %v238_v11, 0.0 }
 0x113   :  { %v194_v12 = vpop.f32.mrf.mxu2 }
 0x114   :  { %v224_v13 = vadd.f32 %v223_v6, %v194_v12  ;;  %v248_v25 = vmul.f32 %v244_v19, %v242_v17 }
 0x116   :  { %v237_v15 = vadd.f32 %v333_v10, %v224_v13  ;;  %v200_v16 = vpop.f32.mrf.mxu3  ;;  %v260_v31 = vsel %vm250_vm0, %v248_v25, -inf }
 0x117   :  { %v230_v18 = vadd.f32 %v229_v14, %v200_v16 }
 0x118   :  { %v191_v20 = vpop.f32.mrf.mxu0  ;;  %v241_v21 = vmax.f32 %v237_v15, 0.0 }
 0x119   :  { %v239_v22 = vadd.f32 %v333_v10, %v230_v18  ;;  %v221_v23 = vadd.f32 %v220_v5, %v191_v20 }
 0x11a   :  { %v247_v28 = vmul.f32 %v245_v24, %v241_v21 }
 0x11b   :  { %v243_v26 = vmax.f32 %v239_v22, 0.0  ;;  %v236_v27 = vadd.f32 %v333_v10, %v221_v23 }
 0x11c   :  { %v252_v35 = vsel %vm250_vm0, %v247_v28, -inf }
 0x11d   :  { %v249_v29 = vmul.f32 %v245_v24, %v243_v26  ;;  %v240_v30 = vmax.f32 %v236_v27, 0.0 }
 0x11f   :  { %v261_v32 = vsel %vm250_vm0, %v249_v29, -inf  ;;  %v246_v33 = vmul.f32 %v244_v19, %v240_v30 }
 0x120   :  { %v262_v34 = vmax.f32 %v260_v31, %v261_v32 }
 0x121   :  { %v251_v36 = vsel %vm250_vm0, %v246_v33, -inf }
 0x122   :  { %v263_v37 = vrot.slane %v262_v34, 4  ;;  %v253_v38 = vmax.f32 %v251_v36, %v252_v35 }
 0x124   :  { %v264_v39 = vmax.f32 %v262_v34, %v263_v37  ;;  %v254_v40 = vrot.slane %v253_v38, 4 }
 0x126   :  { %v265_v41 = vrot.slane %v264_v39, 2  ;;  %v255_v42 = vmax.f32 %v253_v38, %v254_v40 }
 0x128   :  { %v256_v43 = vrot.slane %v255_v42, 2  ;;  %v266_v44 = vmax.f32 %v264_v39, %v265_v41 }
 0x12a   :  { %v257_v45 = vmax.f32 %v255_v42, %v256_v43  ;;  %v267_v46 = vrot.slane %v266_v44, 1 }
 0x12c   :  { %v258_v47 = vrot.slane %v257_v45, 1  ;;  %v268_v49 = vmax.f32 %v266_v44, %v267_v46 }
 0x12e   :  { %v259_v48 = vmax.f32 %v257_v45, %v258_v47 }
 0x130   :  { %v272_v50 = vsel %vm271_vm1, %v268_v49, %v259_v48 }
 0x131   :  { %275 = vst.msk [vmem:[#allocation3] sm:$0x3] %vm274_vm2, %v272_v50 }
 0x132   :  { %286 = dma.vmem_to_hbm [thread:$0]  %s282_s3, 32, %s284_s19, [#allocation4]  }
 0x133   :  { %358 = dma.done.wait [#allocation4], 32  }
 0x134   :  { %359 = vsyncadd [#allocation4], 4294967264 }
 0x135   :  { %291 = vsyncpa [#allocation4], 1 }

</bundles_post_ra>
